<compile_context>
chip_gen: v7x
topology: tpu7x:2x2x1
jax: 0.10.0
libtpu: 0.0.40
codegen_flags: <defaults>
</compile_context>

<pallas_src>
import jax
import jax.numpy as jnp
from jax.experimental import pallas as pl
from jax.experimental.pallas import tpu as pltpu

CIN, COUT, K = 3, 8, 3
STRIDE, PAD, DIL = 2, 1, 2
HIN = WIN = 62                       # chosen so conv output is 30x30 (reshape to (1,8,30,30) valid)
HOUT = WOUT = 30                     # floor((62 + 2*1 - 2*(3-1) - 1)/2) + 1 = 30
HW = HOUT * WOUT                     # 900
KK = CIN * K * K                     # 27
KKB = KK + 1                         # 28: bias folded in as an extra ones-row / weight column


def _conv_relu_softmax_mul_kernel(wb_ref, p_ref, o_ref):
    # conv + bias as one channel-major matmul on the MXU: (8, 28) @ (28, 900) -> (8, 900)
    y = jnp.dot(wb_ref[...], p_ref[...], preferred_element_type=jnp.float32)
    y = jnp.maximum(y, 0.0)                                                      # relu
    # global softmax over all 7200 elements (two-step keepdims reductions)
    m = jnp.max(jnp.max(y, axis=1, keepdims=True), axis=0, keepdims=True)        # (1, 1)
    e = jnp.exp(y - m)
    denom = jnp.sum(jnp.sum(e, axis=1, keepdims=True), axis=0, keepdims=True)    # (1, 1)
    inv = pl.reciprocal(denom, approx=False)   # exact: one scalar on the idle EUP slot
    o_ref[...] = y * e * inv                   # v6 = v4 * softmax(v4)


@jax.jit
def model_forward(x, w, b):
    """x: (1, 3, 62, 62) NCHW f32; w: (8, 3, 3, 3) OIHW; b: (8,). Returns (8, 30, 30)."""
    # --- glue: one fused patches op -> (27, 900), feature order (c, kh, kw) ---
    patches = jax.lax.conv_general_dilated_patches(
        x.astype(jnp.float32), (K, K),
        window_strides=(STRIDE, STRIDE),
        padding=((PAD, PAD), (PAD, PAD)),
        rhs_dilation=(DIL, DIL),
    )                                                          # (1, 27, 30, 30)
    patches = patches.reshape(KK, HW)                          # (27, 900)
    # fold bias: ones row on patches, bias column on weights
    patches = jnp.concatenate(
        [patches, jnp.ones((1, HW), jnp.float32)], axis=0)     # (28, 900)
    wb = jnp.concatenate(
        [w.reshape(COUT, KK).astype(jnp.float32),
         b.reshape(COUT, 1).astype(jnp.float32)], axis=1)      # (8, 28)

    # --- hot path in Pallas (single program, whole problem fits VMEM with huge margin) ---
    out = pl.pallas_call(
        _conv_relu_softmax_mul_kernel,
        out_shape=jax.ShapeDtypeStruct((COUT, HW), jnp.float32),
        in_specs=[pl.BlockSpec(memory_space=pltpu.MemorySpace.VMEM)] * 2,
        out_specs=pl.BlockSpec(memory_space=pltpu.MemorySpace.VMEM),
    )(wb, patches)                                             # (8, 900) lane-dense

    # (8, 900) -> (8, 30, 30): already PyTorch's C-major flatten order (no transpose)
    return out.reshape(COUT, HOUT, WOUT)


def _reference(x, w, b):
    y = jax.lax.conv_general_dilated(
        x, w, window_strides=(STRIDE, STRIDE),
        padding=((PAD, PAD), (PAD, PAD)), rhs_dilation=(DIL, DIL),
        dimension_numbers=("NCHW", "OIHW", "NCHW")) + b.reshape(1, COUT, 1, 1)
    y = jnp.maximum(y, 0.0)
    flat = y.reshape(1, -1)
    sm = jax.nn.softmax(flat, axis=-1)
    return (flat * sm).reshape(COUT, HOUT, WOUT)


if __name__ == "__main__":
    key = jax.random.PRNGKey(0)
    kx, kw, kb = jax.random.split(key, 3)

    x = jax.random.normal(kx, (1, CIN, HIN, WIN), dtype=jnp.float32)
    fan_in = CIN * K * K
    bound = 1.0 / (fan_in ** 0.5)
    w = jax.random.uniform(kw, (COUT, CIN, K, K), minval=-bound, maxval=bound, dtype=jnp.float32)
    b = jax.random.uniform(kb, (COUT,), minval=-bound, maxval=bound, dtype=jnp.float32)

    out = model_forward(x, w, b)
    jax.block_until_ready(out)

    ref = _reference(x, w, b)
    assert out.shape == (COUT, HOUT, WOUT)
    assert bool(jnp.allclose(out, ref, rtol=1e-3, atol=1e-5)), float(jnp.max(jnp.abs(out - ref)))
    print("KERNEL_OK")
</pallas_src>

<mosaic_0001>
module attributes {stable_mosaic.version = 11 : i64} {
  func.func @_conv_relu_softmax_mul_kernel(%arg0: memref<8x28xf32, #tpu.memory_space<vmem>>, %arg1: memref<28x900xf32, #tpu.memory_space<vmem>>, %arg2: memref<8x900xf32, #tpu.memory_space<vmem>>) attributes {dimension_semantics = [], scalar_prefetch = 0 : i64, scratch_operands = 0 : i64, tpu.core_type = #tpu.core_type<tc>} {
    %c0 = arith.constant 0 : index
    %c0_0 = arith.constant 0 : index
    %0 = vector.load %arg0[%c0, %c0_0] : memref<8x28xf32, #tpu.memory_space<vmem>>, vector<8x28xf32>
    %c0_1 = arith.constant 0 : index
    %c0_2 = arith.constant 0 : index
    %1 = vector.load %arg1[%c0_1, %c0_2] : memref<28x900xf32, #tpu.memory_space<vmem>>, vector<28x900xf32>
    %cst = arith.constant dense<0.000000e+00> : vector<8x900xf32>
    %2 = tpu.matmul %0, %1, %cst {dimension_numbers = #tpu.dot_dimension_numbers<[1], [0], [0], [1], [0, 0, 1, 1], [], []>} : vector<8x28xf32>, vector<28x900xf32>, vector<8x900xf32> -> vector<8x900xf32>
    %cst_3 = arith.constant 0.000000e+00 : f32
    %3 = vector.broadcast %cst_3 : f32 to vector<8x900xf32>
    %4 = arith.maximumf %2, %3 : vector<8x900xf32>
    %cst_4 = arith.constant dense<0xFF800000> : vector<8xf32>
    %5 = vector.multi_reduction <maximumf>, %4, %cst_4 [1] : vector<8x900xf32> to vector<8xf32>
    %6 = vector.shape_cast %5 : vector<8xf32> to vector<8x1xf32>
    %cst_5 = arith.constant dense<0xFF800000> : vector<1xf32>
    %7 = vector.multi_reduction <maximumf>, %6, %cst_5 [0] : vector<8x1xf32> to vector<1xf32>
    %8 = vector.shape_cast %7 : vector<1xf32> to vector<1x1xf32>
    %9 = vector.broadcast %8 : vector<1x1xf32> to vector<8x900xf32>
    %10 = arith.subf %4, %9 : vector<8x900xf32>
    %11 = math.exp %10 : vector<8x900xf32>
    %cst_6 = arith.constant dense<0.000000e+00> : vector<8xf32>
    %12 = vector.multi_reduction <add>, %11, %cst_6 [1] : vector<8x900xf32> to vector<8xf32>
    %13 = vector.shape_cast %12 : vector<8xf32> to vector<8x1xf32>
    %cst_7 = arith.constant dense<0.000000e+00> : vector<1xf32>
    %14 = vector.multi_reduction <add>, %13, %cst_7 [0] : vector<8x1xf32> to vector<1xf32>
    %15 = vector.shape_cast %14 : vector<1xf32> to vector<1x1xf32>
    %16 = tpu.reciprocal %15 : vector<1x1xf32> -> vector<1x1xf32>
    %17 = arith.mulf %4, %11 : vector<8x900xf32>
    %18 = vector.broadcast %16 : vector<1x1xf32> to vector<8x900xf32>
    %19 = arith.mulf %17, %18 : vector<8x900xf32>
    %c0_8 = arith.constant 0 : index
    %c0_9 = arith.constant 0 : index
    %20 = vector.load %arg2[%c0_8, %c0_9] : memref<8x900xf32, #tpu.memory_space<vmem>>, vector<8x900xf32>
    tpu.vector_store %arg2[%c0_8, %c0_9], %19 {strides = array<i32>} : memref<8x900xf32, #tpu.memory_space<vmem>>, vector<8x900xf32>,
    return
  }
}

</mosaic_0001>

<bundles_post_ra>
// kernel: model_forward.1
= control target key start
LH: loop header
LB: loop body
LE: loop exit
PB: predicated region body
PF: predicated region fallthrough
CT: control target
= control target key end

     0   :  { %vm48_vm0 = vcmask 1043456   ;;  %v523_v3 = vmov 0.0   ;;  %vm524_vm1 = vmmov 1   ;;  %vm44_vm3 = vcmask 228352   ;;  %s735_s1 = inlined_call_operand.vmem [shape: f32[28,900], index: 1, kind: input, shape index: {}]   ;;  %s736_s0 = inlined_call_operand.vmem [shape: f32[8,28], index: 0, kind: input, shape index: {}]   ;;  %s737_s2 = inlined_call_operand.vmem [shape: f32[8,900], index: 2, kind: output, shape index: {}]  }
   0x1   :  { %v13_v0 = vld [vmem:[%s735_s1 + $0x8] sm:$0xff]  ;;  %v15_v2 = vld [vmem:[%s735_s1 + $0x18] sm:$0xff]  ;;  %208 = vmatprep.mubr.f32.mxu1 %v523_v3  ;;  %137 = vmatprep.mubr.f32.mxu0 %v523_v3  ;;  %v12_v6 = vld [vmem:[%s735_s1] sm:$0xff]  ;;  %vm368_vm4 = vcmask 31744  }
   0x2   :  { %v21_v1 = vld [vmem:[%s735_s1 + $0x48] sm:$0xff]  ;;  %v23_v5 = vld [vmem:[%s735_s1 + $0x58] sm:$0xff]  ;;  %v20_v7 = vld [vmem:[%s735_s1 + $0x40] sm:$0xff] }
   0x3   :  { %v463_v4 = vpack.c.bf16 %v21_v1, %v13_v0  ;;  %v473_v8 = vpack.c.bf16 %v23_v5, %v15_v2  ;;  %v465_v9 = vpack.c.bf16 %v20_v7, %v12_v6  ;;  %v14_v10 = vld [vmem:[%s735_s1 + $0x10] sm:$0xff]  ;;  %v29_v12 = vld [vmem:[%s735_s1 + $0x88] sm:$0xff]  ;;  %vm573_vm2 = vmpackc.low %vm48_vm0, %vm524_vm1 }
   0x4   :  { %v22_v11 = vld [vmem:[%s735_s1 + $0x50] sm:$0xff]  ;;  %v37_v14 = vld [vmem:[%s735_s1 + $0xc8] sm:$0xf]  ;;  %v31_v16 = vld [vmem:[%s735_s1 + $0x98] sm:$0xff] }
   0x5   :  { %464 = vmatprep.subr.bf16.mxu0 %v463_v4  ;;  %v475_v13 = vpack.c.bf16 %v22_v11, %v14_v10  ;;  %474 = vmatprep.subr.bf16.mxu1 %v473_v8  ;;  %v467_v17 = vpack.c.bf16 %v37_v14, %v29_v12  ;;  %v39_v18 = vld [vmem:[%s735_s1 + $0xd8] sm:$0xf]  ;;  %v28_v19 = vld [vmem:[%s735_s1 + $0x80] sm:$0xff]  ;;  %v30_v23 = vld [vmem:[%s735_s1 + $0x90] sm:$0xff] }
   0x6   :  { %466 = vmatpush1.bf16.msra.mxu0 %v465_v9  ;;  %v36_v20 = vld [vmem:[%s735_s1 + $0xc0] sm:$0xf]  ;;  %v477_v21 = vpack.c.bf16 %v39_v18, %v31_v16  ;;  %v38_v24 = vld [vmem:[%s735_s1 + $0xd0] sm:$0xf]  ;;  %v17_v27 = vld [vmem:[%s735_s1 + $0x28] sm:$0xff] }
   0x7   :  { %476 = vmatpush1.bf16.msra.mxu1 %v475_v13  ;;  %v470_v22 = vpack.c.bf16 %v36_v20, %v28_v19  ;;  %469 = vmatprep.subr.msk.bf16.mxu0 %vm573_vm2, %v467_v17  ;;  %v480_v25 = vpack.c.bf16 %v38_v24, %v30_v23  ;;  %v11_v26 = vld [vmem:[%s736_s0] sm:$0xff]  ;;  %v25_v28 = vld [vmem:[%s735_s1 + $0x68] sm:$0xff]  ;;  %v19_v29 = vld [vmem:[%s735_s1 + $0x38] sm:$0xff] }
   0x8   :  { %479 = vmatprep.subr.msk.bf16.mxu1 %vm573_vm2, %v477_v21  ;;  %v483_v30 = vpack.c.bf16 %v25_v28, %v17_v27  ;;  %v27_v31 = vld [vmem:[%s735_s1 + $0x78] sm:$0xff]  ;;  %v16_v32 = vld [vmem:[%s735_s1 + $0x20] sm:$0xff]  ;;  %v18_v36 = vld [vmem:[%s735_s1 + $0x30] sm:$0xff] }
   0x9   :  { %v24_v33 = vld [vmem:[%s735_s1 + $0x60] sm:$0xff]  ;;  %v493_v34 = vpack.c.bf16 %v27_v31, %v19_v29  ;;  %v26_v37 = vld [vmem:[%s735_s1 + $0x70] sm:$0xff]  ;;  %v33_v38 = vld [vmem:[%s735_s1 + $0xa8] sm:$0xff] }
   0xa   :  { %472 = vmatpush1.bf16.msk.msra.mxu0 %vm573_vm2, %v470_v22  ;;  %v485_v35 = vpack.c.bf16 %v24_v33, %v16_v32  ;;  %v495_v39 = vpack.c.bf16 %v26_v37, %v18_v36  ;;  %v41_v40 = vld [vmem:[%s735_s1 + $0xe8] sm:$0xf]  ;;  %v35_v41 = vld [vmem:[%s735_s1 + $0xb8] sm:$0xff]  ;;  %v32_v45 = vld [vmem:[%s735_s1 + $0xa0] sm:$0xff] }
   0xb   :  { %482 = vmatpush1.bf16.msk.msra.mxu1 %vm573_vm2, %v480_v25  ;;  %484 = vmatprep.subr.bf16.mxu0 %v483_v30  ;;  %v43_v42 = vld [vmem:[%s735_s1 + $0xf8] sm:$0xf]  ;;  %v487_v43 = vpack.c.bf16 %v41_v40, %v33_v38  ;;  %v40_v46 = vld [vmem:[%s735_s1 + $0xe0] sm:$0xf]  ;;  %v34_v47 = vld [vmem:[%s735_s1 + $0xb0] sm:$0xff] }
   0xc   :  { %494 = vmatprep.subr.bf16.mxu1 %v493_v34  ;;  %v497_v44 = vpack.c.bf16 %v43_v42, %v35_v41  ;;  %v42_v48 = vld [vmem:[%s735_s1 + $0xf0] sm:$0xf]  ;;  %v490_v49 = vpack.c.bf16 %v40_v46, %v32_v45 }
   0xd   :  { %453 = vmatmul.mubr.msk.f32.vlgmr.msra.gmra.mrb[0].mxu0 %vm44_vm3, %v11_v26  ;;  %v500_v50 = vpack.c.bf16 %v42_v48, %v34_v47 }
   0xe   :  { %456 = vmatmul.mubr.msk.f32.vlgmr.msra.gmra.mrb[0].mxu1 %vm44_vm3, %v11_v26  ;;  %486 = vmatpush1.bf16.msra.mxu0 %v485_v35 }
   0xf   :  { %496 = vmatpush1.bf16.msra.mxu1 %v495_v39  ;;  %489 = vmatprep.subr.msk.bf16.mxu0 %vm573_vm2, %v487_v43 }
  0x10   :  { %499 = vmatprep.subr.msk.bf16.mxu1 %vm573_vm2, %v497_v44  ;;  %279 = vmatprep.mubr.f32.mxu0 %v523_v3 }
  0x11   :  { %350 = vmatprep.mubr.f32.mxu1 %v523_v3 }
  0x12   :  { %492 = vmatpush1.bf16.msk.msra.mxu0 %vm573_vm2, %v490_v49 }
  0x13   :  { %502 = vmatpush1.bf16.msk.msra.mxu1 %vm573_vm2, %v500_v50 }
  0x15   :  { %459 = vmatmul.mubr.msk.f32.vlgmr.msra.gmra.mrb[2].mxu0 %vm44_vm3, %v11_v26 }
  0x16   :  { %462 = vmatmul.mubr.msk.f32.vlgmr.msra.gmra.mrb[2].mxu1 %vm44_vm3, %v11_v26 }
  0xe0   :  { %v139_v51 = vpop.f32.mrb[0].mxu0 }
  0xe1   :  { %v210_v52 = vpop.f32.mrb[0].mxu1  ;;  %v141_v53 = vpop.f32.mrb[1].mxu0  ;;  %v668_v56 = vmax.f32 %v139_v51, 0.0 }
  0xe2   :  { %v212_v54 = vpop.f32.mrb[1].mxu1  ;;  %v672_v60 = vmax.f32 %v141_v53, 0.0  ;;  %v682_v2 = vmax.f32 %v210_v52, 0.0 }
  0xe3   :  { %v684_v3 = vmax.f32 %v212_v54, 0.0 }
  0xe8   :  { %v281_v55 = vpop.f32.mrb[2].mxu0 }
  0xe9   :  { %v670_v57 = vmax.f32 %v281_v55, 0.0  ;;  %v352_v58 = vpop.f32.mrb[2].mxu1  ;;  %v283_v59 = vpop.f32.mrb[3].mxu0 }
  0xea   :  { %v674_v61 = vmax.f32 %v352_v58, 0.0  ;;  %v676_v62 = vmax.f32 %v283_v59, 0.0  ;;  %v354_v63 = vpop.f32.mrb[3].mxu1 }
  0xeb   :  { %v678_v0 = vmax.f32 %v354_v63, 0.0  ;;  %v365_v1 = vmax.f32 %v668_v56, %v670_v57 }
  0xec   :  { %v366_v4 = vmax.f32 %v672_v60, %v676_v62  ;;  %v367_v6 = vmax.f32 %v682_v2, %v674_v61 }
  0xed   :  { %v369_v5 = vsel %vm368_vm4, %v678_v0, -inf }
  0xee   :  { %v370_v7 = vmax.f32 %v684_v3, %v369_v5  ;;  %v371_v8 = vmax.f32 %v365_v1, %v366_v4 }
  0xf0   :  { %v372_v9 = vmax.f32 %v367_v6, %v370_v7 }
  0xf2   :  { %v373_v10 = vmax.f32 %v371_v8, %v372_v9 }
  0xf4   :  { %374 = vmax.xlane.f32.xlu0 %v373_v10 }
 0x181   :  { %v375_v11 = vpop.xlane.xlu0 %374 }
 0x182   :  { %v376_v12 = vrot.slane %v375_v11, 4 }
 0x184   :  { %v377_v13 = vmax.f32 %v375_v11, %v376_v12 }
 0x186   :  { %v378_v14 = vrot.slane %v377_v13, 2 }
 0x188   :  { %v379_v15 = vmax.f32 %v377_v13, %v378_v14 }
 0x18a   :  { %v380_v16 = vrot.slane %v379_v15, 1 }
 0x18c   :  { %v381_v17 = vmax.f32 %v379_v15, %v380_v16 }
 0x18e   :  { %v382_v18 = vsub.f32 %v668_v56, %v381_v17  ;;  %v383_v19 = vsub.f32 %v672_v60, %v381_v17  ;;  %v384_v20 = vsub.f32 %v682_v2, %v381_v17  ;;  %v385_v21 = vsub.f32 %v684_v3, %v381_v17 }
 0x18f   :  { %v386_v24 = vsub.f32 %v670_v57, %v381_v17  ;;  %v387_v26 = vsub.f32 %v676_v62, %v381_v17  ;;  %v389_v28 = vsub.f32 %v678_v0, %v381_v17  ;;  %v388_v29 = vsub.f32 %v674_v61, %v381_v17 }
 0x190   :  { %v390_v22 = vmul.f32 1.442695, %v382_v18  ;;  %v392_v23 = vmul.f32 1.442695, %v383_v19  ;;  %v394_v25 = vmul.f32 1.442695, %v384_v20 }
 0x191   :  { %v396_v27 = vmul.f32 1.442695, %v385_v21  ;;  %v398_v30 = vmul.f32 1.442695, %v386_v24  ;;  %v400_v31 = vmul.f32 1.442695, %v387_v26 }
 0x192   :  { %505 = vpow2.f32 %v390_v22  ;;  %v404_v32 = vmul.f32 1.442695, %v389_v28  ;;  %v402_v33 = vmul.f32 1.442695, %v388_v29 }
 0x193   :  { %507 = vpow2.f32 %v392_v23 }
 0x194   :  { %509 = vpow2.f32 %v394_v25 }
 0x195   :  { %511 = vpow2.f32 %v396_v27 }
 0x196   :  { %513 = vpow2.f32 %v398_v30 }
 0x197   :  { %515 = vpow2.f32 %v400_v31 }
 0x198   :  { %517 = vpow2.f32 %v404_v32 }
 0x199   :  { %519 = vpow2.f32 %v402_v33 }
 0x19c   :  { %v506_v34 = vpop.eup %505 }
 0x19d   :  { %v508_v35 = vpop.eup %507  ;;  %v423_v59 = vmul.f32 %v506_v34, %v668_v56 }
 0x19e   :  { %v406_v36 = vadd.f32 %v508_v35, %v506_v34  ;;  %v510_v37 = vpop.eup %509  ;;  %v424_v63 = vmul.f32 %v508_v35, %v672_v60 }
 0x19f   :  { %v512_v39 = vpop.eup %511  ;;  %v425_v1 = vmul.f32 %v510_v37, %v682_v2 }
 0x1a0   :  { %v407_v38 = vadd.f32 %v510_v37, %v406_v36  ;;  %v514_v41 = vpop.eup %513  ;;  %v426_v4 = vmul.f32 %v512_v39, %v684_v3 }
 0x1a1   :  { %v516_v43 = vpop.eup %515  ;;  %v427_v6 = vmul.f32 %v514_v41, %v670_v57 }
 0x1a2   :  { %v408_v40 = vadd.f32 %v512_v39, %v407_v38  ;;  %v518_v44 = vpop.eup %517  ;;  %v428_v7 = vmul.f32 %v516_v43, %v676_v62 }
 0x1a3   :  { %v520_v46 = vpop.eup %519  ;;  %v412_v48 = vsel %vm368_vm4, %v518_v44, 0.0  ;;  %v430_v9 = vmul.f32 %v518_v44, %v678_v0 }
 0x1a4   :  { %v409_v42 = vadd.f32 %v514_v41, %v408_v40  ;;  %v429_v8 = vmul.f32 %v520_v46, %v674_v61 }
 0x1a6   :  { %v410_v45 = vadd.f32 %v516_v43, %v409_v42 }
 0x1a8   :  { %v411_v47 = vadd.f32 %v520_v46, %v410_v45 }
 0x1aa   :  { %v413_v49 = vadd.f32 %v412_v48, %v411_v47 }
 0x1ac   :  { %414 = vadd.xlane.f32.xlu0 %v413_v49 }
 0x239   :  { %v415_v50 = vpop.xlane.xlu0 %414 }
 0x23a   :  { %v416_v51 = vrot.slane %v415_v50, 4 }
 0x23c   :  { %v417_v52 = vadd.f32 %v416_v51, %v415_v50 }
 0x23e   :  { %v418_v53 = vrot.slane %v417_v52, 2 }
 0x240   :  { %v419_v54 = vadd.f32 %v418_v53, %v417_v52 }
 0x242   :  { %v420_v55 = vrot.slane %v419_v54, 1 }
 0x244   :  { %v421_v58 = vadd.f32 %v420_v55, %v419_v54 }
 0x246   :  { %521 = vrcp.f32 %v421_v58 }
 0x250   :  { %v522_v5 = vpop.eup %521 }
 0x251   :  { %v431_v10 = vmul.f32 %v522_v5, %v423_v59  ;;  %v432_v11 = vmul.f32 %v522_v5, %v424_v63  ;;  %v433_v12 = vmul.f32 %v522_v5, %v425_v1  ;;  %v434_v13 = vmul.f32 %v522_v5, %v426_v4 }
 0x252   :  { %v435_v56 = vmul.f32 %v522_v5, %v427_v6  ;;  %v436_v14 = vmul.f32 %v522_v5, %v428_v7  ;;  %v437_v60 = vmul.f32 %v522_v5, %v429_v8  ;;  %v438_v15 = vmul.f32 %v522_v5, %v430_v9 }
 0x253   :  { %439 = vst [vmem:[%s737_s2] sm:$0xff] %v431_v10  ;;  %440 = vst [vmem:[%s737_s2 + $0x8] sm:$0xff] %v432_v11 }
 0x254   :  { %441 = vst [vmem:[%s737_s2 + $0x10] sm:$0xff] %v433_v12  ;;  %442 = vst [vmem:[%s737_s2 + $0x18] sm:$0xff] %v434_v13 }
 0x255   :  { %443 = vst [vmem:[%s737_s2 + $0x20] sm:$0xff] %v435_v56  ;;  %444 = vst [vmem:[%s737_s2 + $0x28] sm:$0xff] %v436_v14 }
 0x256   :  { %445 = vst [vmem:[%s737_s2 + $0x30] sm:$0xff] %v437_v60  ;;  %446 = vst.msk [vmem:[%s737_s2 + $0x38] sm:$0xff] %vm368_vm4, %v438_v15 }

</bundles_post_ra>
